<compile_context>
chip_gen: v7x
topology: tpu7x:2x2x1
jax: 0.10.0
libtpu: 0.0.40
codegen_flags: <defaults>
</compile_context>

<pallas_src>
import numpy as np
import jax
import jax.numpy as jnp
from jax.experimental import pallas as pl
from jax.experimental.pallas import tpu as pltpu


def _cutmix_gather_kernel(src_ref, x_hbm, o_ref, gbuf, sems):
    # src_ref: SMEM (B_pad,) int32  — source row per output row (scalar prefetch)
    # x_hbm:   (B, F) input, left in HBM (memory_space=pl.ANY)
    # o_ref:   (TB, F) output block (VMEM, auto-pipelined store)
    # gbuf:    (TB, F) VMEM gather scratch
    # sems:    (TB,) DMA semaphores
    i = pl.program_id(0)
    tb = o_ref.shape[0]
    base = i * tb

    # Issue all per-row gather DMAs, then wait; the copies overlap in the DMA engines.
    copies = []
    for r in range(tb):
        cp = pltpu.make_async_copy(x_hbm.at[src_ref[base + r]], gbuf.at[r], sems.at[r])
        cp.start()
        copies.append(cp)
    for cp in copies:
        cp.wait()

    # Single lane-dense (TB, F) store; the pipeline writes it back as one big DMA.
    o_ref[...] = gbuf[...]


def cutmix_pallas(x, perm, mask):
    """x: (B, ...) array; perm: (B,) int permutation; mask: (B,) {0,1} floats."""
    orig_shape = x.shape
    orig_dtype = x.dtype
    B = x.shape[0]
    F = int(np.prod(x.shape[1:])) if x.ndim > 1 else 1
    x2 = x.reshape(B, F)

    # Bernoulli mask is exactly {0,1}  =>  blend == exact row select.
    src = jnp.where(mask > 0.5,
                    perm.astype(jnp.int32),
                    jnp.arange(B, dtype=jnp.int32))

    # --- choose rows-per-block (TB) ---------------------------------------
    row_bytes = max(1, F * np.dtype(orig_dtype).itemsize)
    if B >= 8:
        # Cap a block at ~8 MiB: out double-buffer (2x) + gather scratch (1x)
        # stays <= ~24 MiB, comfortably inside the 48 MiB VMEM budget.
        tb_max = min(B, 256, max(8, (8 << 20) // row_bytes))
        nblk = -(-B // tb_max)
        tb = -(-B // nblk)
        tb = -(-tb // 8) * 8          # sublane-dense (multiple of 8)
    else:
        tb = B                        # full-extent block is always layout-legal
    nblk = -(-B // tb)
    B_pad = nblk * tb
    if B_pad != B:                    # pad the gather indices; extra rows sliced off
        src = jnp.concatenate([src, jnp.zeros((B_pad - B,), jnp.int32)])

    grid_spec = pltpu.PrefetchScalarGridSpec(
        num_scalar_prefetch=1,                         # src lands in SMEM
        grid=(nblk,),
        in_specs=[pl.BlockSpec(memory_space=pl.ANY)],  # x stays in HBM; manual gather
        out_specs=pl.BlockSpec((tb, F), lambda i, src: (i, 0)),
        scratch_shapes=[
            pltpu.VMEM((tb, F), orig_dtype),           # gather buffer
            pltpu.SemaphoreType.DMA((tb,)),            # one DMA sem per gathered row
        ],
    )

    out = pl.pallas_call(
        _cutmix_gather_kernel,
        grid_spec=grid_spec,
        out_shape=jax.ShapeDtypeStruct((B_pad, F), orig_dtype),
        compiler_params=pltpu.CompilerParams(
            dimension_semantics=("parallel",),         # independent blocks -> 2 TCs on v7x
            vmem_limit_bytes=48 * 1024 * 1024,         # > v5e 16 MiB default, < v7x 64 MiB
        ),
    )(src, x2)

    if B_pad != B:
        out = out[:B]
    return out.reshape(orig_shape)


if __name__ == "__main__":
    # Module "parameter": p (no learnable weights).
    p = 0.5

    key = jax.random.PRNGKey(0)
    kx, kperm, kbern, kx2, kperm2, kbern2 = jax.random.split(key, 6)

    # ---- test 1: (batch, hidden) f32 --------------------------------------
    B, F = 8, 256
    x = jax.random.normal(kx, (B, F), dtype=jnp.float32)
    perm = jax.random.permutation(kperm, B)                        # torch.randperm
    mask = (jax.random.uniform(kbern, (B,)) < p).astype(jnp.float32)  # torch.bernoulli

    out = jax.block_until_ready(cutmix_pallas(x, perm, mask))
    ref = x * (1.0 - mask[:, None]) + x[perm] * mask[:, None]
    assert out.dtype == x.dtype
    assert np.allclose(np.asarray(out), np.asarray(ref), atol=1e-6, rtol=1e-6)

    # ---- test 2: image-like (B, C, H, W) bf16, exercises flatten + B < 8 ---
    B2 = 2
    x_img = jax.random.normal(kx2, (B2, 4, 16, 16), dtype=jnp.bfloat16)
    perm2 = jax.random.permutation(kperm2, B2)
    mask2 = (jax.random.uniform(kbern2, (B2,)) < p).astype(jnp.float32)

    out2 = jax.block_until_ready(cutmix_pallas(x_img, perm2, mask2))
    sel2 = jnp.where(mask2 > 0.5, perm2, jnp.arange(B2))
    ref2 = x_img[sel2]                                             # exact row select
    assert out2.dtype == x_img.dtype
    assert np.array_equal(np.asarray(out2), np.asarray(ref2))

    print("KERNEL_OK")
</pallas_src>

<mosaic_0001>
module attributes {stable_mosaic.version = 11 : i64} {
  func.func @_cutmix_gather_kernel(%arg0: i32, %arg1: memref<8xi32, #tpu.memory_space<smem>>, %arg2: memref<8x256xf32, #tpu.memory_space<any>>, %arg3: memref<8x256xf32, #tpu.memory_space<vmem>>, %arg4: memref<8x256xf32, #tpu.memory_space<vmem>>, %arg5: memref<8x!tpu.dma_semaphore, #tpu.memory_space<semaphore_mem>>) attributes {dimension_semantics = [#tpu.dimension_semantics<parallel>], iteration_bounds = array<i64: 1>, scalar_prefetch = 1 : i64, scratch_operands = 2 : i64, tpu.core_type = #tpu.core_type<tc>, window_params = [{}, {transform_indices = @transform_1, window_bounds = array<i64: 8, 256>}]} {
    %c8_i32 = arith.constant 8 : i32
    %0 = arith.muli %arg0, %c8_i32 : i32
    %c0_i32 = arith.constant 0 : i32
    %1 = arith.addi %0, %c0_i32 : i32
    %2 = arith.index_cast %1 : i32 to index
    %3 = memref.load %arg1[%2] : memref<8xi32, #tpu.memory_space<smem>>
    %c0_i32_0 = arith.constant 0 : i32
    %c0_i32_1 = arith.constant 0 : i32
    %c0_i32_2 = arith.constant 0 : i32
    %4 = tpu.memref_slice %arg2[%3, %c0_i32_2] : memref<8x256xf32, #tpu.memory_space<any>> -> memref<1x256xf32, #tpu.memory_space<any>>
    %5 = tpu.memref_squeeze %4 : memref<1x256xf32, #tpu.memory_space<any>> -> memref<256xf32, #tpu.memory_space<any>>
    %c0_i32_3 = arith.constant 0 : i32
    %6 = tpu.memref_slice %arg4[%c0_i32_0, %c0_i32_3] : memref<8x256xf32, #tpu.memory_space<vmem>> -> memref<1x256xf32, #tpu.memory_space<vmem>>
    %7 = tpu.memref_squeeze %6 : memref<1x256xf32, #tpu.memory_space<vmem>> -> memref<256xf32, #tpu.memory_space<vmem>>
    %8 = tpu.memref_slice %arg5[%c0_i32_1] : memref<8x!tpu.dma_semaphore, #tpu.memory_space<semaphore_mem>> -> memref<1x!tpu.dma_semaphore, #tpu.memory_space<semaphore_mem>>
    %9 = tpu.memref_squeeze %8 : memref<1x!tpu.dma_semaphore, #tpu.memory_space<semaphore_mem>> -> memref<!tpu.dma_semaphore, #tpu.memory_space<semaphore_mem>>
    tpu.enqueue_dma source(%5 : memref<256xf32, #tpu.memory_space<any>>) target(%7 : memref<256xf32, #tpu.memory_space<vmem>>) target_semaphore(%9 : memref<!tpu.dma_semaphore, #tpu.memory_space<semaphore_mem>>)
    %c1_i32 = arith.constant 1 : i32
    %10 = arith.addi %0, %c1_i32 : i32
    %11 = arith.index_cast %10 : i32 to index
    %12 = memref.load %arg1[%11] : memref<8xi32, #tpu.memory_space<smem>>
    %c1_i32_4 = arith.constant 1 : i32
    %c1_i32_5 = arith.constant 1 : i32
    %c0_i32_6 = arith.constant 0 : i32
    %13 = tpu.memref_slice %arg2[%12, %c0_i32_6] : memref<8x256xf32, #tpu.memory_space<any>> -> memref<1x256xf32, #tpu.memory_space<any>>
    %14 = tpu.memref_squeeze %13 : memref<1x256xf32, #tpu.memory_space<any>> -> memref<256xf32, #tpu.memory_space<any>>
    %c0_i32_7 = arith.constant 0 : i32
    %15 = tpu.memref_slice %arg4[%c1_i32_4, %c0_i32_7] : memref<8x256xf32, #tpu.memory_space<vmem>> -> memref<1x256xf32, #tpu.memory_space<vmem>>
    %16 = tpu.memref_squeeze %15 : memref<1x256xf32, #tpu.memory_space<vmem>> -> memref<256xf32, #tpu.memory_space<vmem>>
    %17 = tpu.memref_slice %arg5[%c1_i32_5] : memref<8x!tpu.dma_semaphore, #tpu.memory_space<semaphore_mem>> -> memref<1x!tpu.dma_semaphore, #tpu.memory_space<semaphore_mem>>
    %18 = tpu.memref_squeeze %17 : memref<1x!tpu.dma_semaphore, #tpu.memory_space<semaphore_mem>> -> memref<!tpu.dma_semaphore, #tpu.memory_space<semaphore_mem>>
    tpu.enqueue_dma source(%14 : memref<256xf32, #tpu.memory_space<any>>) target(%16 : memref<256xf32, #tpu.memory_space<vmem>>) target_semaphore(%18 : memref<!tpu.dma_semaphore, #tpu.memory_space<semaphore_mem>>)
    %c2_i32 = arith.constant 2 : i32
    %19 = arith.addi %0, %c2_i32 : i32
    %20 = arith.index_cast %19 : i32 to index
    %21 = memref.load %arg1[%20] : memref<8xi32, #tpu.memory_space<smem>>
    %c2_i32_8 = arith.constant 2 : i32
    %c2_i32_9 = arith.constant 2 : i32
    %c0_i32_10 = arith.constant 0 : i32
    %22 = tpu.memref_slice %arg2[%21, %c0_i32_10] : memref<8x256xf32, #tpu.memory_space<any>> -> memref<1x256xf32, #tpu.memory_space<any>>
    %23 = tpu.memref_squeeze %22 : memref<1x256xf32, #tpu.memory_space<any>> -> memref<256xf32, #tpu.memory_space<any>>
    %c0_i32_11 = arith.constant 0 : i32
    %24 = tpu.memref_slice %arg4[%c2_i32_8, %c0_i32_11] : memref<8x256xf32, #tpu.memory_space<vmem>> -> memref<1x256xf32, #tpu.memory_space<vmem>>
    %25 = tpu.memref_squeeze %24 : memref<1x256xf32, #tpu.memory_space<vmem>> -> memref<256xf32, #tpu.memory_space<vmem>>
    %26 = tpu.memref_slice %arg5[%c2_i32_9] : memref<8x!tpu.dma_semaphore, #tpu.memory_space<semaphore_mem>> -> memref<1x!tpu.dma_semaphore, #tpu.memory_space<semaphore_mem>>
    %27 = tpu.memref_squeeze %26 : memref<1x!tpu.dma_semaphore, #tpu.memory_space<semaphore_mem>> -> memref<!tpu.dma_semaphore, #tpu.memory_space<semaphore_mem>>
    tpu.enqueue_dma source(%23 : memref<256xf32, #tpu.memory_space<any>>) target(%25 : memref<256xf32, #tpu.memory_space<vmem>>) target_semaphore(%27 : memref<!tpu.dma_semaphore, #tpu.memory_space<semaphore_mem>>)
    %c3_i32 = arith.constant 3 : i32
    %28 = arith.addi %0, %c3_i32 : i32
    %29 = arith.index_cast %28 : i32 to index
    %30 = memref.load %arg1[%29] : memref<8xi32, #tpu.memory_space<smem>>
    %c3_i32_12 = arith.constant 3 : i32
    %c3_i32_13 = arith.constant 3 : i32
    %c0_i32_14 = arith.constant 0 : i32
    %31 = tpu.memref_slice %arg2[%30, %c0_i32_14] : memref<8x256xf32, #tpu.memory_space<any>> -> memref<1x256xf32, #tpu.memory_space<any>>
    %32 = tpu.memref_squeeze %31 : memref<1x256xf32, #tpu.memory_space<any>> -> memref<256xf32, #tpu.memory_space<any>>
    %c0_i32_15 = arith.constant 0 : i32
    %33 = tpu.memref_slice %arg4[%c3_i32_12, %c0_i32_15] : memref<8x256xf32, #tpu.memory_space<vmem>> -> memref<1x256xf32, #tpu.memory_space<vmem>>
    %34 = tpu.memref_squeeze %33 : memref<1x256xf32, #tpu.memory_space<vmem>> -> memref<256xf32, #tpu.memory_space<vmem>>
    %35 = tpu.memref_slice %arg5[%c3_i32_13] : memref<8x!tpu.dma_semaphore, #tpu.memory_space<semaphore_mem>> -> memref<1x!tpu.dma_semaphore, #tpu.memory_space<semaphore_mem>>
    %36 = tpu.memref_squeeze %35 : memref<1x!tpu.dma_semaphore, #tpu.memory_space<semaphore_mem>> -> memref<!tpu.dma_semaphore, #tpu.memory_space<semaphore_mem>>
    tpu.enqueue_dma source(%32 : memref<256xf32, #tpu.memory_space<any>>) target(%34 : memref<256xf32, #tpu.memory_space<vmem>>) target_semaphore(%36 : memref<!tpu.dma_semaphore, #tpu.memory_space<semaphore_mem>>)
    %c4_i32 = arith.constant 4 : i32
    %37 = arith.addi %0, %c4_i32 : i32
    %38 = arith.index_cast %37 : i32 to index
    %39 = memref.load %arg1[%38] : memref<8xi32, #tpu.memory_space<smem>>
    %c4_i32_16 = arith.constant 4 : i32
    %c4_i32_17 = arith.constant 4 : i32
    %c0_i32_18 = arith.constant 0 : i32
    %40 = tpu.memref_slice %arg2[%39, %c0_i32_18] : memref<8x256xf32, #tpu.memory_space<any>> -> memref<1x256xf32, #tpu.memory_space<any>>
    %41 = tpu.memref_squeeze %40 : memref<1x256xf32, #tpu.memory_space<any>> -> memref<256xf32, #tpu.memory_space<any>>
    %c0_i32_19 = arith.constant 0 : i32
    %42 = tpu.memref_slice %arg4[%c4_i32_16, %c0_i32_19] : memref<8x256xf32, #tpu.memory_space<vmem>> -> memref<1x256xf32, #tpu.memory_space<vmem>>
    %43 = tpu.memref_squeeze %42 : memref<1x256xf32, #tpu.memory_space<vmem>> -> memref<256xf32, #tpu.memory_space<vmem>>
    %44 = tpu.memref_slice %arg5[%c4_i32_17] : memref<8x!tpu.dma_semaphore, #tpu.memory_space<semaphore_mem>> -> memref<1x!tpu.dma_semaphore, #tpu.memory_space<semaphore_mem>>
    %45 = tpu.memref_squeeze %44 : memref<1x!tpu.dma_semaphore, #tpu.memory_space<semaphore_mem>> -> memref<!tpu.dma_semaphore, #tpu.memory_space<semaphore_mem>>
    tpu.enqueue_dma source(%41 : memref<256xf32, #tpu.memory_space<any>>) target(%43 : memref<256xf32, #tpu.memory_space<vmem>>) target_semaphore(%45 : memref<!tpu.dma_semaphore, #tpu.memory_space<semaphore_mem>>)
    %c5_i32 = arith.constant 5 : i32
    %46 = arith.addi %0, %c5_i32 : i32
    %47 = arith.index_cast %46 : i32 to index
    %48 = memref.load %arg1[%47] : memref<8xi32, #tpu.memory_space<smem>>
    %c5_i32_20 = arith.constant 5 : i32
    %c5_i32_21 = arith.constant 5 : i32
    %c0_i32_22 = arith.constant 0 : i32
    %49 = tpu.memref_slice %arg2[%48, %c0_i32_22] : memref<8x256xf32, #tpu.memory_space<any>> -> memref<1x256xf32, #tpu.memory_space<any>>
    %50 = tpu.memref_squeeze %49 : memref<1x256xf32, #tpu.memory_space<any>> -> memref<256xf32, #tpu.memory_space<any>>
    %c0_i32_23 = arith.constant 0 : i32
    %51 = tpu.memref_slice %arg4[%c5_i32_20, %c0_i32_23] : memref<8x256xf32, #tpu.memory_space<vmem>> -> memref<1x256xf32, #tpu.memory_space<vmem>>
    %52 = tpu.memref_squeeze %51 : memref<1x256xf32, #tpu.memory_space<vmem>> -> memref<256xf32, #tpu.memory_space<vmem>>
    %53 = tpu.memref_slice %arg5[%c5_i32_21] : memref<8x!tpu.dma_semaphore, #tpu.memory_space<semaphore_mem>> -> memref<1x!tpu.dma_semaphore, #tpu.memory_space<semaphore_mem>>
    %54 = tpu.memref_squeeze %53 : memref<1x!tpu.dma_semaphore, #tpu.memory_space<semaphore_mem>> -> memref<!tpu.dma_semaphore, #tpu.memory_space<semaphore_mem>>
    tpu.enqueue_dma source(%50 : memref<256xf32, #tpu.memory_space<any>>) target(%52 : memref<256xf32, #tpu.memory_space<vmem>>) target_semaphore(%54 : memref<!tpu.dma_semaphore, #tpu.memory_space<semaphore_mem>>)
    %c6_i32 = arith.constant 6 : i32
    %55 = arith.addi %0, %c6_i32 : i32
    %56 = arith.index_cast %55 : i32 to index
    %57 = memref.load %arg1[%56] : memref<8xi32, #tpu.memory_space<smem>>
    %c6_i32_24 = arith.constant 6 : i32
    %c6_i32_25 = arith.constant 6 : i32
    %c0_i32_26 = arith.constant 0 : i32
    %58 = tpu.memref_slice %arg2[%57, %c0_i32_26] : memref<8x256xf32, #tpu.memory_space<any>> -> memref<1x256xf32, #tpu.memory_space<any>>
    %59 = tpu.memref_squeeze %58 : memref<1x256xf32, #tpu.memory_space<any>> -> memref<256xf32, #tpu.memory_space<any>>
    %c0_i32_27 = arith.constant 0 : i32
    %60 = tpu.memref_slice %arg4[%c6_i32_24, %c0_i32_27] : memref<8x256xf32, #tpu.memory_space<vmem>> -> memref<1x256xf32, #tpu.memory_space<vmem>>
    %61 = tpu.memref_squeeze %60 : memref<1x256xf32, #tpu.memory_space<vmem>> -> memref<256xf32, #tpu.memory_space<vmem>>
    %62 = tpu.memref_slice %arg5[%c6_i32_25] : memref<8x!tpu.dma_semaphore, #tpu.memory_space<semaphore_mem>> -> memref<1x!tpu.dma_semaphore, #tpu.memory_space<semaphore_mem>>
    %63 = tpu.memref_squeeze %62 : memref<1x!tpu.dma_semaphore, #tpu.memory_space<semaphore_mem>> -> memref<!tpu.dma_semaphore, #tpu.memory_space<semaphore_mem>>
    tpu.enqueue_dma source(%59 : memref<256xf32, #tpu.memory_space<any>>) target(%61 : memref<256xf32, #tpu.memory_space<vmem>>) target_semaphore(%63 : memref<!tpu.dma_semaphore, #tpu.memory_space<semaphore_mem>>)
    %c7_i32 = arith.constant 7 : i32
    %64 = arith.addi %0, %c7_i32 : i32
    %65 = arith.index_cast %64 : i32 to index
    %66 = memref.load %arg1[%65] : memref<8xi32, #tpu.memory_space<smem>>
    %c7_i32_28 = arith.constant 7 : i32
    %c7_i32_29 = arith.constant 7 : i32
    %c0_i32_30 = arith.constant 0 : i32
    %67 = tpu.memref_slice %arg2[%66, %c0_i32_30] : memref<8x256xf32, #tpu.memory_space<any>> -> memref<1x256xf32, #tpu.memory_space<any>>
    %68 = tpu.memref_squeeze %67 : memref<1x256xf32, #tpu.memory_space<any>> -> memref<256xf32, #tpu.memory_space<any>>
    %c0_i32_31 = arith.constant 0 : i32
    %69 = tpu.memref_slice %arg4[%c7_i32_28, %c0_i32_31] : memref<8x256xf32, #tpu.memory_space<vmem>> -> memref<1x256xf32, #tpu.memory_space<vmem>>
    %70 = tpu.memref_squeeze %69 : memref<1x256xf32, #tpu.memory_space<vmem>> -> memref<256xf32, #tpu.memory_space<vmem>>
    %71 = tpu.memref_slice %arg5[%c7_i32_29] : memref<8x!tpu.dma_semaphore, #tpu.memory_space<semaphore_mem>> -> memref<1x!tpu.dma_semaphore, #tpu.memory_space<semaphore_mem>>
    %72 = tpu.memref_squeeze %71 : memref<1x!tpu.dma_semaphore, #tpu.memory_space<semaphore_mem>> -> memref<!tpu.dma_semaphore, #tpu.memory_space<semaphore_mem>>
    tpu.enqueue_dma source(%68 : memref<256xf32, #tpu.memory_space<any>>) target(%70 : memref<256xf32, #tpu.memory_space<vmem>>) target_semaphore(%72 : memref<!tpu.dma_semaphore, #tpu.memory_space<semaphore_mem>>)
    %c0_i32_32 = arith.constant 0 : i32
    %c0_i32_33 = arith.constant 0 : i32
    %c0_i32_34 = arith.constant 0 : i32
    %73 = tpu.memref_slice %arg2[%3, %c0_i32_34] : memref<8x256xf32, #tpu.memory_space<any>> -> memref<1x256xf32, #tpu.memory_space<any>>
    %74 = tpu.memref_squeeze %73 : memref<1x256xf32, #tpu.memory_space<any>> -> memref<256xf32, #tpu.memory_space<any>>
    %c0_i32_35 = arith.constant 0 : i32
    %75 = tpu.memref_slice %arg4[%c0_i32_32, %c0_i32_35] : memref<8x256xf32, #tpu.memory_space<vmem>> -> memref<1x256xf32, #tpu.memory_space<vmem>>
    %76 = tpu.memref_squeeze %75 : memref<1x256xf32, #tpu.memory_space<vmem>> -> memref<256xf32, #tpu.memory_space<vmem>>
    %77 = tpu.memref_slice %arg5[%c0_i32_33] : memref<8x!tpu.dma_semaphore, #tpu.memory_space<semaphore_mem>> -> memref<1x!tpu.dma_semaphore, #tpu.memory_space<semaphore_mem>>
    %78 = tpu.memref_squeeze %77 : memref<1x!tpu.dma_semaphore, #tpu.memory_space<semaphore_mem>> -> memref<!tpu.dma_semaphore, #tpu.memory_space<semaphore_mem>>
    tpu.wait_dma2 semaphore(%78 : memref<!tpu.dma_semaphore, #tpu.memory_space<semaphore_mem>>) src(%74 : memref<256xf32, #tpu.memory_space<any>>) dst(%76 : memref<256xf32, #tpu.memory_space<vmem>>)
    %c1_i32_36 = arith.constant 1 : i32
    %c1_i32_37 = arith.constant 1 : i32
    %c0_i32_38 = arith.constant 0 : i32
    %79 = tpu.memref_slice %arg2[%12, %c0_i32_38] : memref<8x256xf32, #tpu.memory_space<any>> -> memref<1x256xf32, #tpu.memory_space<any>>
    %80 = tpu.memref_squeeze %79 : memref<1x256xf32, #tpu.memory_space<any>> -> memref<256xf32, #tpu.memory_space<any>>
    %c0_i32_39 = arith.constant 0 : i32
    %81 = tpu.memref_slice %arg4[%c1_i32_36, %c0_i32_39] : memref<8x256xf32, #tpu.memory_space<vmem>> -> memref<1x256xf32, #tpu.memory_space<vmem>>
    %82 = tpu.memref_squeeze %81 : memref<1x256xf32, #tpu.memory_space<vmem>> -> memref<256xf32, #tpu.memory_space<vmem>>
    %83 = tpu.memref_slice %arg5[%c1_i32_37] : memref<8x!tpu.dma_semaphore, #tpu.memory_space<semaphore_mem>> -> memref<1x!tpu.dma_semaphore, #tpu.memory_space<semaphore_mem>>
    %84 = tpu.memref_squeeze %83 : memref<1x!tpu.dma_semaphore, #tpu.memory_space<semaphore_mem>> -> memref<!tpu.dma_semaphore, #tpu.memory_space<semaphore_mem>>
    tpu.wait_dma2 semaphore(%84 : memref<!tpu.dma_semaphore, #tpu.memory_space<semaphore_mem>>) src(%80 : memref<256xf32, #tpu.memory_space<any>>) dst(%82 : memref<256xf32, #tpu.memory_space<vmem>>)
    %c2_i32_40 = arith.constant 2 : i32
    %c2_i32_41 = arith.constant 2 : i32
    %c0_i32_42 = arith.constant 0 : i32
    %85 = tpu.memref_slice %arg2[%21, %c0_i32_42] : memref<8x256xf32, #tpu.memory_space<any>> -> memref<1x256xf32, #tpu.memory_space<any>>
    %86 = tpu.memref_squeeze %85 : memref<1x256xf32, #tpu.memory_space<any>> -> memref<256xf32, #tpu.memory_space<any>>
    %c0_i32_43 = arith.constant 0 : i32
    %87 = tpu.memref_slice %arg4[%c2_i32_40, %c0_i32_43] : memref<8x256xf32, #tpu.memory_space<vmem>> -> memref<1x256xf32, #tpu.memory_space<vmem>>
    %88 = tpu.memref_squeeze %87 : memref<1x256xf32, #tpu.memory_space<vmem>> -> memref<256xf32, #tpu.memory_space<vmem>>
    %89 = tpu.memref_slice %arg5[%c2_i32_41] : memref<8x!tpu.dma_semaphore, #tpu.memory_space<semaphore_mem>> -> memref<1x!tpu.dma_semaphore, #tpu.memory_space<semaphore_mem>>
    %90 = tpu.memref_squeeze %89 : memref<1x!tpu.dma_semaphore, #tpu.memory_space<semaphore_mem>> -> memref<!tpu.dma_semaphore, #tpu.memory_space<semaphore_mem>>
    tpu.wait_dma2 semaphore(%90 : memref<!tpu.dma_semaphore, #tpu.memory_space<semaphore_mem>>) src(%86 : memref<256xf32, #tpu.memory_space<any>>) dst(%88 : memref<256xf32, #tpu.memory_space<vmem>>)
    %c3_i32_44 = arith.constant 3 : i32
    %c3_i32_45 = arith.constant 3 : i32
    %c0_i32_46 = arith.constant 0 : i32
    %91 = tpu.memref_slice %arg2[%30, %c0_i32_46] : memref<8x256xf32, #tpu.memory_space<any>> -> memref<1x256xf32, #tpu.memory_space<any>>
    %92 = tpu.memref_squeeze %91 : memref<1x256xf32, #tpu.memory_space<any>> -> memref<256xf32, #tpu.memory_space<any>>
    %c0_i32_47 = arith.constant 0 : i32
    %93 = tpu.memref_slice %arg4[%c3_i32_44, %c0_i32_47] : memref<8x256xf32, #tpu.memory_space<vmem>> -> memref<1x256xf32, #tpu.memory_space<vmem>>
    %94 = tpu.memref_squeeze %93 : memref<1x256xf32, #tpu.memory_space<vmem>> -> memref<256xf32, #tpu.memory_space<vmem>>
    %95 = tpu.memref_slice %arg5[%c3_i32_45] : memref<8x!tpu.dma_semaphore, #tpu.memory_space<semaphore_mem>> -> memref<1x!tpu.dma_semaphore, #tpu.memory_space<semaphore_mem>>
    %96 = tpu.memref_squeeze %95 : memref<1x!tpu.dma_semaphore, #tpu.memory_space<semaphore_mem>> -> memref<!tpu.dma_semaphore, #tpu.memory_space<semaphore_mem>>
    tpu.wait_dma2 semaphore(%96 : memref<!tpu.dma_semaphore, #tpu.memory_space<semaphore_mem>>) src(%92 : memref<256xf32, #tpu.memory_space<any>>) dst(%94 : memref<256xf32, #tpu.memory_space<vmem>>)
    %c4_i32_48 = arith.constant 4 : i32
    %c4_i32_49 = arith.constant 4 : i32
    %c0_i32_50 = arith.constant 0 : i32
    %97 = tpu.memref_slice %arg2[%39, %c0_i32_50] : memref<8x256xf32, #tpu.memory_space<any>> -> memref<1x256xf32, #tpu.memory_space<any>>
    %98 = tpu.memref_squeeze %97 : memref<1x256xf32, #tpu.memory_space<any>> -> memref<256xf32, #tpu.memory_space<any>>
    %c0_i32_51 = arith.constant 0 : i32
    %99 = tpu.memref_slice %arg4[%c4_i32_48, %c0_i32_51] : memref<8x256xf32, #tpu.memory_space<vmem>> -> memref<1x256xf32, #tpu.memory_space<vmem>>
    %100 = tpu.memref_squeeze %99 : memref<1x256xf32, #tpu.memory_space<vmem>> -> memref<256xf32, #tpu.memory_space<vmem>>
    %101 = tpu.memref_slice %arg5[%c4_i32_49] : memref<8x!tpu.dma_semaphore, #tpu.memory_space<semaphore_mem>> -> memref<1x!tpu.dma_semaphore, #tpu.memory_space<semaphore_mem>>
    %102 = tpu.memref_squeeze %101 : memref<1x!tpu.dma_semaphore, #tpu.memory_space<semaphore_mem>> -> memref<!tpu.dma_semaphore, #tpu.memory_space<semaphore_mem>>
    tpu.wait_dma2 semaphore(%102 : memref<!tpu.dma_semaphore, #tpu.memory_space<semaphore_mem>>) src(%98 : memref<256xf32, #tpu.memory_space<any>>) dst(%100 : memref<256xf32, #tpu.memory_space<vmem>>)
    %c5_i32_52 = arith.constant 5 : i32
    %c5_i32_53 = arith.constant 5 : i32
    %c0_i32_54 = arith.constant 0 : i32
    %103 = tpu.memref_slice %arg2[%48, %c0_i32_54] : memref<8x256xf32, #tpu.memory_space<any>> -> memref<1x256xf32, #tpu.memory_space<any>>
    %104 = tpu.memref_squeeze %103 : memref<1x256xf32, #tpu.memory_space<any>> -> memref<256xf32, #tpu.memory_space<any>>
    %c0_i32_55 = arith.constant 0 : i32
    %105 = tpu.memref_slice %arg4[%c5_i32_52, %c0_i32_55] : memref<8x256xf32, #tpu.memory_space<vmem>> -> memref<1x256xf32, #tpu.memory_space<vmem>>
    %106 = tpu.memref_squeeze %105 : memref<1x256xf32, #tpu.memory_space<vmem>> -> memref<256xf32, #tpu.memory_space<vmem>>
    %107 = tpu.memref_slice %arg5[%c5_i32_53] : memref<8x!tpu.dma_semaphore, #tpu.memory_space<semaphore_mem>> -> memref<1x!tpu.dma_semaphore, #tpu.memory_space<semaphore_mem>>
    %108 = tpu.memref_squeeze %107 : memref<1x!tpu.dma_semaphore, #tpu.memory_space<semaphore_mem>> -> memref<!tpu.dma_semaphore, #tpu.memory_space<semaphore_mem>>
    tpu.wait_dma2 semaphore(%108 : memref<!tpu.dma_semaphore, #tpu.memory_space<semaphore_mem>>) src(%104 : memref<256xf32, #tpu.memory_space<any>>) dst(%106 : memref<256xf32, #tpu.memory_space<vmem>>)
    %c6_i32_56 = arith.constant 6 : i32
    %c6_i32_57 = arith.constant 6 : i32
    %c0_i32_58 = arith.constant 0 : i32
    %109 = tpu.memref_slice %arg2[%57, %c0_i32_58] : memref<8x256xf32, #tpu.memory_space<any>> -> memref<1x256xf32, #tpu.memory_space<any>>
    %110 = tpu.memref_squeeze %109 : memref<1x256xf32, #tpu.memory_space<any>> -> memref<256xf32, #tpu.memory_space<any>>
    %c0_i32_59 = arith.constant 0 : i32
    %111 = tpu.memref_slice %arg4[%c6_i32_56, %c0_i32_59] : memref<8x256xf32, #tpu.memory_space<vmem>> -> memref<1x256xf32, #tpu.memory_space<vmem>>
    %112 = tpu.memref_squeeze %111 : memref<1x256xf32, #tpu.memory_space<vmem>> -> memref<256xf32, #tpu.memory_space<vmem>>
    %113 = tpu.memref_slice %arg5[%c6_i32_57] : memref<8x!tpu.dma_semaphore, #tpu.memory_space<semaphore_mem>> -> memref<1x!tpu.dma_semaphore, #tpu.memory_space<semaphore_mem>>
    %114 = tpu.memref_squeeze %113 : memref<1x!tpu.dma_semaphore, #tpu.memory_space<semaphore_mem>> -> memref<!tpu.dma_semaphore, #tpu.memory_space<semaphore_mem>>
    tpu.wait_dma2 semaphore(%114 : memref<!tpu.dma_semaphore, #tpu.memory_space<semaphore_mem>>) src(%110 : memref<256xf32, #tpu.memory_space<any>>) dst(%112 : memref<256xf32, #tpu.memory_space<vmem>>)
    %c7_i32_60 = arith.constant 7 : i32
    %c7_i32_61 = arith.constant 7 : i32
    %c0_i32_62 = arith.constant 0 : i32
    %115 = tpu.memref_slice %arg2[%66, %c0_i32_62] : memref<8x256xf32, #tpu.memory_space<any>> -> memref<1x256xf32, #tpu.memory_space<any>>
    %116 = tpu.memref_squeeze %115 : memref<1x256xf32, #tpu.memory_space<any>> -> memref<256xf32, #tpu.memory_space<any>>
    %c0_i32_63 = arith.constant 0 : i32
    %117 = tpu.memref_slice %arg4[%c7_i32_60, %c0_i32_63] : memref<8x256xf32, #tpu.memory_space<vmem>> -> memref<1x256xf32, #tpu.memory_space<vmem>>
    %118 = tpu.memref_squeeze %117 : memref<1x256xf32, #tpu.memory_space<vmem>> -> memref<256xf32, #tpu.memory_space<vmem>>
    %119 = tpu.memref_slice %arg5[%c7_i32_61] : memref<8x!tpu.dma_semaphore, #tpu.memory_space<semaphore_mem>> -> memref<1x!tpu.dma_semaphore, #tpu.memory_space<semaphore_mem>>
    %120 = tpu.memref_squeeze %119 : memref<1x!tpu.dma_semaphore, #tpu.memory_space<semaphore_mem>> -> memref<!tpu.dma_semaphore, #tpu.memory_space<semaphore_mem>>
    tpu.wait_dma2 semaphore(%120 : memref<!tpu.dma_semaphore, #tpu.memory_space<semaphore_mem>>) src(%116 : memref<256xf32, #tpu.memory_space<any>>) dst(%118 : memref<256xf32, #tpu.memory_space<vmem>>)
    %c0 = arith.constant 0 : index
    %c0_64 = arith.constant 0 : index
    %121 = vector.load %arg4[%c0, %c0_64] : memref<8x256xf32, #tpu.memory_space<vmem>>, vector<8x256xf32>
    %c0_65 = arith.constant 0 : index
    %c0_66 = arith.constant 0 : index
    %122 = vector.load %arg3[%c0_65, %c0_66] : memref<8x256xf32, #tpu.memory_space<vmem>>, vector<8x256xf32>
    tpu.vector_store %arg3[%c0_65, %c0_66], %121 {strides = array<i32>} : memref<8x256xf32, #tpu.memory_space<vmem>>, vector<8x256xf32>,
    return
  }
  func.func @transform_1(%arg0: i32, %arg1: memref<8xi32, #tpu.memory_space<smem>>) -> (i32, i32) {
    %c0_i32 = arith.constant 0 : i32
    %c0_i32_0 = arith.constant 0 : i32
    return %arg0, %c0_i32 : i32, i32
  }
}

</mosaic_0001>

<bundles_post_ra>
// kernel: tpu_custom_call.1
= control target key start
LH: loop header
LB: loop body
LE: loop exit
PB: predicated region body
PF: predicated region fallthrough
CT: control target
= control target key end

     0   :  { %s755_s0 = inlined_call_operand.hbm [shape: s32[8], index: 0, kind: input, shape index: {}]   ;;  %s756_s1 = inlined_call_operand.hbm [shape: f32[8,256], index: 1, kind: input, shape index: {}]   ;;  %s757_s2 = inlined_call_operand.hbm [shape: f32[8,256], index: 2, kind: output, shape index: {}]  }
   0x1   :  { %s294_s11 = scalar_lea.hbm %s755_s0, 16 }
   0x2   :  { %p295_p0 = scmp.ne.s32.totalorder %s755_s0, %s294_s11  ;;  %p298_p1 = scmp.lt.u32.totalorder %s294_s11, %s755_s0 }
   0x4   :  { %p300_p2 = pnand %p298_p1, %p295_p0 }
   0x6   :  { %303 = shalt.err (!%p300_p2)  }
   0x7   :  { %s538_s16 = smov [#allocation5]  }
   0x8   :  { %8 = dma.hbm_to_smem %s755_s0, 16, %s538_s16, [#allocation4] }
   0x9   :  { %518 = dma.done.wait [#allocation4], 16 }
   0xa   :  { %519 = vsyncadd [#allocation4], 4294967280 }
   0xb   :  { %10 = sfence }
   0xc   :  { %11 = vsyncpa [#allocation7], 0  ;;  %s13_s19 = sld [smem:[#allocation5]]  ;;  %s539_s20 = smov [#allocation2]  }
   0xd   :  { %s21_s21 = sshll.u32 %s539_s20, 4  ;;  %s579_s22 = sld [smem:[#allocation5 + $0x1]]  ;;  %s577_s21 = int_to_ptr.vmem [resolvable:$true] %s21_s21 }
   0xe   :  { %s540_s23 = smov [#allocation2 + $0x1]   ;;  %s581_s25 = sld [smem:[#allocation5 + $0x2]] }
   0xf   :  { %s36_s24 = sshll.u32 %s540_s23, 4  ;;  %s541_s28 = smov [#allocation2 + $0x2]   ;;  %s583_s24 = int_to_ptr.vmem [resolvable:$true] %s36_s24 }
  0x10   :  { %s51_s29 = sshll.u32 %s541_s28, 4  ;;  %s595_s12 = scalar_lea.hbm %s756_s1, 256  ;;  %s585_s29 = int_to_ptr.vmem [resolvable:$true] %s51_s29 }
  0x12   :  { %s14_s0 = sshrl.u32 %s13_s19, 3  ;;  %s15_s26 = sand.u32 7, %s13_s19  }
  0x13   :  { %s251_s27 = sshll.u32 %s14_s0, 4  ;;  %s27_s4 = sshrl.u32 %s579_s22, 3 }
  0x14   :  { %s17_s30 = sadd.s32 %s251_s27, %s15_s26  ;;  %s28_s8 = sand.u32 7, %s579_s22  }
  0x15   :  { %s252_s3 = sshll.u32 %s17_s30, 4 }
  0x16   :  { %s19_s7 = scalar_lea.hbm %s756_s1, %s252_s3 }
  0x17   :  { %s304_s9 = scalar_lea.hbm %s19_s7, 32  ;;  %p307_p4 = scmp.lt.u32.totalorder %s19_s7, %s756_s1 }
  0x18   :  { %p305_p3 = scmp.ne.s32.totalorder %s19_s7, %s304_s9  ;;  %p308_p5 = scmp.lt.u32.totalorder %s595_s12, %s304_s9 }
  0x19   :  { %p310_p7 = scmp.lt.u32.totalorder %s304_s9, %s19_s7 }
  0x1a   :  { %p309_p6 = por %p308_p5, %p307_p4 }
  0x1c   :  { %p311_p8 = por %p310_p7, %p309_p6 }
  0x1e   :  { %p312_p9 = pnand %p311_p8, %p305_p3 }
  0x20   :  { %315 = shalt.err (!%p312_p9)  }
  0x21   :  { %s316_s15 = scalar_lea.vmem %s577_s21, 32  ;;  %s604_s16 = scalar_lea.vmem %s577_s21, 256 }
  0x22   :  { %p317_p10 = scmp.ne.s32.totalorder %s577_s21, %s316_s15  ;;  %p321_p11 = scmp.lt.s32.totalorder %s577_s21, %s577_s21 }
  0x23   :  { %p322_p12 = scmp.lt.s32.totalorder %s604_s16, %s316_s15 }
  0x25   :  { %p323_p13 = por %p322_p12, %p321_p11 }
  0x27   :  { %p324_p0 = pnand %p323_p13, %p317_p10 }
  0x29   :  { %327 = shalt.err (!%p324_p0)  }
  0x2a   :  { %s542_s17 = smov 128   ;;  %s543_s18 = smov 1  }
  0x2b   :  { %24 = dma.hbm_to_vmem [thread:$0]  %s19_s7, 32, %s577_s21, [#allocation3], %s542_s17, %s542_s17, %s543_s18 }
  0x2c   :  { %s254_s19 = sshll.u32 %s27_s4, 4  ;;  %s42_s20 = sshrl.u32 %s581_s25, 3 }
  0x2d   :  { %s30_s22 = sadd.s32 %s254_s19, %s28_s8  ;;  %s43_s23 = sand.u32 7, %s581_s25  }
  0x2e   :  { %s255_s0 = sshll.u32 %s30_s22, 4  ;;  %s257_s26 = sshll.u32 %s42_s20, 4 }
  0x2f   :  { %s32_s30 = scalar_lea.hbm %s756_s1, %s255_s0  ;;  %s45_s3 = sadd.s32 %s257_s26, %s43_s23 }
  0x30   :  { %s328_s5 = scalar_lea.hbm %s32_s30, 32  ;;  %p331_p2 = scmp.lt.u32.totalorder %s32_s30, %s756_s1 }
  0x31   :  { %p329_p1 = scmp.ne.s32.totalorder %s32_s30, %s328_s5  ;;  %p332_p3 = scmp.lt.u32.totalorder %s595_s12, %s328_s5 }
  0x32   :  { %p334_p5 = scmp.lt.u32.totalorder %s328_s5, %s32_s30 }
  0x33   :  { %p333_p4 = por %p332_p3, %p331_p2 }
  0x35   :  { %p335_p6 = por %p334_p5, %p333_p4 }
  0x37   :  { %p336_p7 = pnand %p335_p6, %p329_p1 }
  0x39   :  { %339 = shalt.err (!%p336_p7)  }
  0x3a   :  { %s340_s25 = scalar_lea.vmem %s583_s24, 32  ;;  %p345_p9 = scmp.lt.s32.totalorder %s583_s24, %s577_s21 }
  0x3b   :  { %p341_p8 = scmp.ne.s32.totalorder %s583_s24, %s340_s25  ;;  %p346_p10 = scmp.lt.s32.totalorder %s604_s16, %s340_s25 }
  0x3d   :  { %p347_p11 = por %p346_p10, %p345_p9 }
  0x3f   :  { %p348_p12 = pnand %p347_p11, %p341_p8 }
  0x41   :  { %351 = shalt.err (!%p348_p12)  }
  0x42   :  { %39 = dma.hbm_to_vmem [thread:$0]  %s32_s30, 32, %s583_s24, [#allocation3 + $0x1], %s542_s17, %s542_s17, %s543_s18 }
  0x43   :  { %s258_s4 = sshll.u32 %s45_s3, 4  ;;  %s631_s7 = sld [smem:[#allocation5 + $0x3]] }
  0x44   :  { %s47_s11 = scalar_lea.hbm %s756_s1, %s258_s4 }
  0x45   :  { %s352_s13 = scalar_lea.hbm %s47_s11, 32  ;;  %p355_p0 = scmp.lt.u32.totalorder %s47_s11, %s756_s1 }
  0x46   :  { %p353_p13 = scmp.ne.s32.totalorder %s47_s11, %s352_s13  ;;  %p356_p1 = scmp.lt.u32.totalorder %s595_s12, %s352_s13 }
  0x47   :  { %p358_p3 = scmp.lt.u32.totalorder %s352_s13, %s47_s11 }
  0x48   :  { %p357_p2 = por %p356_p1, %p355_p0 }
  0x4a   :  { %p359_p4 = por %p358_p3, %p357_p2 }
  0x4c   :  { %p360_p5 = pnand %p359_p4, %p353_p13 }
  0x4e   :  { %363 = shalt.err (!%p360_p5)  }
  0x4f   :  { %s364_s24 = scalar_lea.vmem %s585_s29, 32  ;;  %p369_p7 = scmp.lt.s32.totalorder %s585_s29, %s577_s21 }
  0x50   :  { %p365_p6 = scmp.ne.s32.totalorder %s585_s29, %s364_s24  ;;  %p370_p8 = scmp.lt.s32.totalorder %s604_s16, %s364_s24 }
  0x52   :  { %p371_p9 = por %p370_p8, %p369_p7 }
  0x54   :  { %p372_p10 = pnand %p371_p9, %p365_p6 }
  0x56   :  { %375 = shalt.err (!%p372_p10)  }
  0x57   :  { %54 = dma.hbm_to_vmem [thread:$0]  %s47_s11, 32, %s585_s29, [#allocation3 + $0x2], %s542_s17, %s542_s17, %s543_s18 }
  0x58   :  { %s544_s19 = smov [#allocation2 + $0x3]   ;;  %s649_s22 = sld [smem:[#allocation5 + $0x4]] }
  0x59   :  { %s66_s20 = sshll.u32 %s544_s19, 4  ;;  %s545_s23 = smov [#allocation2 + $0x4]   ;;  %s651_s20 = int_to_ptr.vmem [resolvable:$true] %s66_s20 }
  0x5a   :  { %s81_s0 = sshll.u32 %s545_s23, 4  ;;  %s653_s26 = sld [smem:[#allocation5 + $0x5]]  ;;  %s657_s0 = int_to_ptr.vmem [resolvable:$true] %s81_s0 }
  0x5b   :  { %s57_s27 = sshrl.u32 %s631_s7, 3  ;;  %s58_s28 = sand.u32 7, %s631_s7  }
  0x5c   :  { %s260_s30 = sshll.u32 %s57_s27, 4 }
  0x5d   :  { %s60_s3 = sadd.s32 %s260_s30, %s58_s28 }
  0x5e   :  { %s261_s29 = sshll.u32 %s60_s3, 4  ;;  %s72_s5 = sshrl.u32 %s649_s22, 3 }
  0x5f   :  { %s62_s25 = scalar_lea.hbm %s756_s1, %s261_s29  ;;  %s73_s4 = sand.u32 7, %s649_s22  }
  0x60   :  { %s376_s8 = scalar_lea.hbm %s62_s25, 32  ;;  %p379_p12 = scmp.lt.u32.totalorder %s62_s25, %s756_s1 }
  0x61   :  { %p377_p11 = scmp.ne.s32.totalorder %s62_s25, %s376_s8  ;;  %p380_p13 = scmp.lt.u32.totalorder %s595_s12, %s376_s8 }
  0x62   :  { %p382_p1 = scmp.lt.u32.totalorder %s376_s8, %s62_s25 }
  0x63   :  { %p381_p0 = por %p380_p13, %p379_p12 }
  0x65   :  { %p383_p2 = por %p382_p1, %p381_p0 }
  0x67   :  { %p384_p3 = pnand %p383_p2, %p377_p11 }
  0x69   :  { %387 = shalt.err (!%p384_p3)  }
  0x6a   :  { %s388_s7 = scalar_lea.vmem %s651_s20, 32  ;;  %p393_p5 = scmp.lt.s32.totalorder %s651_s20, %s577_s21 }
  0x6b   :  { %p389_p4 = scmp.ne.s32.totalorder %s651_s20, %s388_s7  ;;  %p394_p6 = scmp.lt.s32.totalorder %s604_s16, %s388_s7 }
  0x6d   :  { %p395_p7 = por %p394_p6, %p393_p5 }
  0x6f   :  { %p396_p8 = pnand %p395_p7, %p389_p4 }
  0x71   :  { %399 = shalt.err (!%p396_p8)  }
  0x72   :  { %69 = dma.hbm_to_vmem [thread:$0]  %s62_s25, 32, %s651_s20, [#allocation3 + $0x3], %s542_s17, %s542_s17, %s543_s18 }
  0x73   :  { %s263_s13 = sshll.u32 %s72_s5, 4  ;;  %s87_s14 = sshrl.u32 %s653_s26, 3 }
  0x74   :  { %s75_s15 = sadd.s32 %s263_s13, %s73_s4  ;;  %s88_s24 = sand.u32 7, %s653_s26  }
  0x75   :  { %s264_s19 = sshll.u32 %s75_s15, 4  ;;  %s266_s22 = sshll.u32 %s87_s14, 4 }
  0x76   :  { %s77_s28 = scalar_lea.hbm %s756_s1, %s264_s19  ;;  %s90_s30 = sadd.s32 %s266_s22, %s88_s24 }
  0x77   :  { %s400_s3 = scalar_lea.hbm %s77_s28, 32  ;;  %p403_p10 = scmp.lt.u32.totalorder %s77_s28, %s756_s1 }
  0x78   :  { %p401_p9 = scmp.ne.s32.totalorder %s77_s28, %s400_s3  ;;  %p404_p11 = scmp.lt.u32.totalorder %s595_s12, %s400_s3 }
  0x79   :  { %p406_p13 = scmp.lt.u32.totalorder %s400_s3, %s77_s28 }
  0x7a   :  { %p405_p12 = por %p404_p11, %p403_p10 }
  0x7c   :  { %p407_p0 = por %p406_p13, %p405_p12 }
  0x7e   :  { %p408_p1 = pnand %p407_p0, %p401_p9 }
  0x80   :  { %411 = shalt.err (!%p408_p1)  }
  0x81   :  { %s412_s20 = scalar_lea.vmem %s657_s0, 32  ;;  %p417_p3 = scmp.lt.s32.totalorder %s657_s0, %s577_s21 }
  0x82   :  { %p413_p2 = scmp.ne.s32.totalorder %s657_s0, %s412_s20  ;;  %p418_p4 = scmp.lt.s32.totalorder %s604_s16, %s412_s20 }
  0x84   :  { %p419_p5 = por %p418_p4, %p417_p3 }
  0x86   :  { %p420_p6 = pnand %p419_p5, %p413_p2 }
  0x88   :  { %423 = shalt.err (!%p420_p6)  }
  0x89   :  { %84 = dma.hbm_to_vmem [thread:$0]  %s77_s28, 32, %s657_s0, [#allocation3 + $0x4], %s542_s17, %s542_s17, %s543_s18 }
  0x8a   :  { %s267_s26 = sshll.u32 %s90_s30, 4  ;;  %s546_s5 = smov [#allocation2 + $0x5]  }
  0x8b   :  { %s96_s9 = sshll.u32 %s546_s5, 4  ;;  %s92_s8 = scalar_lea.hbm %s756_s1, %s267_s26  ;;  %s97_s9 = int_to_ptr.vmem [resolvable:$true] %s96_s9 }
  0x8c   :  { %s424_s10 = scalar_lea.hbm %s92_s8, 32  ;;  %p427_p8 = scmp.lt.u32.totalorder %s92_s8, %s756_s1 }
  0x8d   :  { %p425_p7 = scmp.ne.s32.totalorder %s92_s8, %s424_s10  ;;  %p428_p9 = scmp.lt.u32.totalorder %s595_s12, %s424_s10 }
  0x8e   :  { %p430_p11 = scmp.lt.u32.totalorder %s424_s10, %s92_s8 }
  0x8f   :  { %p429_p10 = por %p428_p9, %p427_p8 }
  0x91   :  { %p431_p12 = por %p430_p11, %p429_p10 }
  0x93   :  { %p432_p13 = pnand %p431_p12, %p425_p7 }
  0x95   :  { %435 = shalt.err (!%p432_p13)  }
  0x96   :  { %s436_s0 = scalar_lea.vmem %s97_s9, 32  ;;  %p441_p1 = scmp.lt.s32.totalorder %s97_s9, %s577_s21 }
  0x97   :  { %p437_p0 = scmp.ne.s32.totalorder %s97_s9, %s436_s0  ;;  %p442_p2 = scmp.lt.s32.totalorder %s604_s16, %s436_s0 }
  0x99   :  { %p443_p3 = por %p442_p2, %p441_p1 }
  0x9b   :  { %p444_p4 = pnand %p443_p3, %p437_p0 }
  0x9d   :  { %447 = shalt.err (!%p444_p4)  }
  0x9e   :  { %99 = dma.hbm_to_vmem [thread:$0]  %s92_s8, 32, %s97_s9, [#allocation3 + $0x5], %s542_s17, %s542_s17, %s543_s18 }
  0x9f   :  { %s268_s13 = sld [smem:[#allocation5 + $0x6]]  ;;  %s271_s14 = sld [smem:[#allocation5 + $0x7]] }
  0xa0   :  { %s547_s15 = smov [#allocation2 + $0x6]   ;;  %s548_s19 = smov [#allocation2 + $0x7]  }
  0xa1   :  { %s111_s24 = sshll.u32 %s547_s15, 4  ;;  %s126_s22 = sshll.u32 %s548_s19, 4  ;;  %s707_s24 = int_to_ptr.vmem [resolvable:$true] %s111_s24  ;;  %s709_s22 = int_to_ptr.vmem [resolvable:$true] %s126_s22 }
  0xa5   :  { %s102_s23 = sshrl.u32 %s268_s13, 3  ;;  %s103_s27 = sand.u32 7, %s268_s13  }
  0xa6   :  { %s269_s28 = sshll.u32 %s102_s23, 4  ;;  %s117_s30 = sshrl.u32 %s271_s14, 3 }
  0xa7   :  { %s105_s3 = sadd.s32 %s269_s28, %s103_s27  ;;  %s118_s29 = sand.u32 7, %s271_s14  }
  0xa8   :  { %s270_s6 = sshll.u32 %s105_s3, 4  ;;  %s272_s20 = sshll.u32 %s117_s30, 4 }
  0xa9   :  { %s107_s9 = scalar_lea.hbm %s756_s1, %s270_s6  ;;  %s120_s25 = sadd.s32 %s272_s20, %s118_s29 }
  0xaa   :  { %s448_s4 = scalar_lea.hbm %s107_s9, 32  ;;  %p451_p6 = scmp.lt.u32.totalorder %s107_s9, %s756_s1 }
  0xab   :  { %p449_p5 = scmp.ne.s32.totalorder %s107_s9, %s448_s4  ;;  %p452_p7 = scmp.lt.u32.totalorder %s595_s12, %s448_s4 }
  0xac   :  { %p454_p9 = scmp.lt.u32.totalorder %s448_s4, %s107_s9 }
  0xad   :  { %p453_p8 = por %p452_p7, %p451_p6 }
  0xaf   :  { %p455_p10 = por %p454_p9, %p453_p8 }
  0xb1   :  { %p456_p11 = pnand %p455_p10, %p449_p5 }
  0xb3   :  { %459 = shalt.err (!%p456_p11)  }
  0xb4   :  { %s460_s11 = scalar_lea.vmem %s707_s24, 32  ;;  %p465_p13 = scmp.lt.s32.totalorder %s707_s24, %s577_s21 }
  0xb5   :  { %p461_p12 = scmp.ne.s32.totalorder %s707_s24, %s460_s11  ;;  %p466_p0 = scmp.lt.s32.totalorder %s604_s16, %s460_s11 }
  0xb7   :  { %p467_p1 = por %p466_p0, %p465_p13 }
  0xb9   :  { %p468_p2 = pnand %p467_p1, %p461_p12 }
  0xbb   :  { %471 = shalt.err (!%p468_p2)  }
  0xbc   :  { %114 = dma.hbm_to_vmem [thread:$0]  %s107_s9, 32, %s707_s24, [#allocation3 + $0x6], %s542_s17, %s542_s17, %s543_s18 }
  0xbd   :  { %s273_s7 = sshll.u32 %s120_s25, 4 }
  0xbe   :  { %s122_s14 = scalar_lea.hbm %s756_s1, %s273_s7 }
  0xbf   :  { %s472_s15 = scalar_lea.hbm %s122_s14, 32  ;;  %p475_p4 = scmp.lt.u32.totalorder %s122_s14, %s756_s1 }
  0xc0   :  { %p473_p3 = scmp.ne.s32.totalorder %s122_s14, %s472_s15  ;;  %p476_p5 = scmp.lt.u32.totalorder %s595_s12, %s472_s15 }
  0xc1   :  { %p478_p7 = scmp.lt.u32.totalorder %s472_s15, %s122_s14 }
  0xc2   :  { %p477_p6 = por %p476_p5, %p475_p4 }
  0xc4   :  { %p479_p8 = por %p478_p7, %p477_p6 }
  0xc6   :  { %p480_p9 = pnand %p479_p8, %p473_p3 }
  0xc8   :  { %483 = shalt.err (!%p480_p9)  }
  0xc9   :  { %s484_s24 = scalar_lea.vmem %s709_s22, 32  ;;  %p489_p11 = scmp.lt.s32.totalorder %s709_s22, %s577_s21 }
  0xca   :  { %p485_p10 = scmp.ne.s32.totalorder %s709_s22, %s484_s24  ;;  %p490_p12 = scmp.lt.s32.totalorder %s604_s16, %s484_s24 }
  0xcc   :  { %p491_p13 = por %p490_p12, %p489_p11 }
  0xce   :  { %p492_p0 = pnand %p491_p13, %p485_p10 }
  0xd0   :  { %495 = shalt.err (!%p492_p0)  }
  0xd1   :  { %129 = dma.hbm_to_vmem [thread:$0]  %s122_s14, 32, %s709_s22, [#allocation3 + $0x7], %s542_s17, %s542_s17, %s543_s18 }
  0xd2   :  { %520 = dma.done.wait [#allocation3], 32 }
  0xd3   :  { %521 = vsyncadd [#allocation3], 4294967264 }
  0xd4   :  { %522 = dma.done.wait [#allocation3 + $0x1], 32 }
  0xd5   :  { %523 = vsyncadd [#allocation3 + $0x1], 4294967264 }
  0xd6   :  { %524 = dma.done.wait [#allocation3 + $0x2], 32 }
  0xd7   :  { %525 = vsyncadd [#allocation3 + $0x2], 4294967264 }
  0xd8   :  { %526 = dma.done.wait [#allocation3 + $0x3], 32 }
  0xd9   :  { %527 = vsyncadd [#allocation3 + $0x3], 4294967264 }
  0xda   :  { %528 = dma.done.wait [#allocation3 + $0x4], 32 }
  0xdb   :  { %529 = vsyncadd [#allocation3 + $0x4], 4294967264 }
  0xdc   :  { %530 = dma.done.wait [#allocation3 + $0x5], 32 }
  0xdd   :  { %531 = vsyncadd [#allocation3 + $0x5], 4294967264 }
  0xde   :  { %532 = dma.done.wait [#allocation3 + $0x6], 32 }
  0xdf   :  { %533 = vsyncadd [#allocation3 + $0x6], 4294967264 }
  0xe0   :  { %534 = dma.done.wait [#allocation3 + $0x7], 32 }
  0xe1   :  { %535 = vsyncadd [#allocation3 + $0x7], 4294967264  ;;  %s549_s1 = smov [#allocation6]   ;;  %v146_v0 = vld [vmem:[#allocation2] sm:$0xff]  ;;  %v147_v1 = vld [vmem:[#allocation2 + $0x8] sm:$0xff] }
  0xe2   :  { %s156_s21 = sshll.u32 %s549_s1, 4  ;;  %148 = vst [vmem:[#allocation6] sm:$0xff] %v146_v0  ;;  %149 = vst [vmem:[#allocation6 + $0x8] sm:$0xff] %v147_v1  ;;  %s157_s21 = int_to_ptr.vmem [resolvable:$true] %s156_s21 }
  0xe3   :  { %s496_s12 = scalar_lea.vmem %s157_s21, 256  ;;  %p501_p2 = scmp.lt.s32.totalorder %s157_s21, %s157_s21 }
  0xe4   :  { %p497_p1 = scmp.ne.s32.totalorder %s157_s21, %s496_s12  ;;  %p502_p3 = scmp.lt.s32.totalorder %s496_s12, %s496_s12 }
  0xe6   :  { %p503_p4 = por %p502_p3, %p501_p2 }
  0xe8   :  { %p504_p5 = pnand %p503_p4, %p497_p1 }
  0xea   :  { %507 = shalt.err (!%p504_p5)
}
  0xeb   :  { %s508_s18 = scalar_lea.hbm %s757_s2, 256 }
  0xec   :  { %p509_p6 = scmp.ne.s32.totalorder %s757_s2, %s508_s18  ;;  %p512_p7 = scmp.lt.u32.totalorder %s508_s18, %s757_s2 }
  0xee   :  { %p514_p8 = pnand %p512_p7, %p509_p6 }
  0xf0   :  { %517 = shalt.err (!%p514_p8)
}
  0xf1   :  { %159 = dma.vmem_to_hbm [thread:$0]  %s157_s21, 256, %s757_s2, [#allocation7]  }
  0xf2   :  { %536 = dma.done.wait [#allocation7], 256  }
  0xf3   :  { %537 = vsyncadd [#allocation7], 4294967040 }
  0xf4   :  { %163 = vsyncpa [#allocation7], 1 }
  0xf5   :  { %164 = vsyncmov [#allocation3] }
  0xf8   :  { %s165_s6 = vpop.sfrf %164 }
  0xf9   :  { %p274_p9 = scmp.ne.s32.totalorder %s165_s6, 0 }
  0xfb   :  { %169 = shalt.err (%p274_p9)  }
  0xfc   :  { %171 = vsyncmov [#allocation3 + $0x1] }
  0xff   :  { %s172_s20 = vpop.sfrf %171 }
 0x100   :  { %p275_p10 = scmp.ne.s32.totalorder %s172_s20, 0 }
 0x102   :  { %176 = shalt.err (%p275_p10)  }
 0x103   :  { %178 = vsyncmov [#allocation3 + $0x2] }
 0x106   :  { %s179_s26 = vpop.sfrf %178 }
 0x107   :  { %p276_p11 = scmp.ne.s32.totalorder %s179_s26, 0 }
 0x109   :  { %183 = shalt.err (%p276_p11)  }
 0x10a   :  { %185 = vsyncmov [#allocation3 + $0x3] }
 0x10d   :  { %s186_s5 = vpop.sfrf %185 }
 0x10e   :  { %p277_p12 = scmp.ne.s32.totalorder %s186_s5, 0 }
 0x110   :  { %190 = shalt.err (%p277_p12)  }
 0x111   :  { %192 = vsyncmov [#allocation3 + $0x4] }
 0x114   :  { %s193_s2 = vpop.sfrf %192 }
 0x115   :  { %p278_p13 = scmp.ne.s32.totalorder %s193_s2, 0 }
 0x117   :  { %197 = shalt.err (%p278_p13)  }
 0x118   :  { %199 = vsyncmov [#allocation3 + $0x5] }
 0x11b   :  { %s200_s9 = vpop.sfrf %199 }
 0x11c   :  { %p279_p0 = scmp.ne.s32.totalorder %s200_s9, 0 }
 0x11e   :  { %204 = shalt.err (%p279_p0)  }
 0x11f   :  { %206 = vsyncmov [#allocation3 + $0x6] }
 0x122   :  { %s207_s25 = vpop.sfrf %206 }
 0x123   :  { %p280_p1 = scmp.ne.s32.totalorder %s207_s25, 0 }
 0x125   :  { %211 = shalt.err (%p280_p1)  }
 0x126   :  { %213 = vsyncmov [#allocation3 + $0x7] }
 0x129   :  { %s214_s4 = vpop.sfrf %213 }
 0x12a   :  { %p281_p2 = scmp.ne.s32.totalorder %s214_s4, 0 }
 0x12c   :  { %218 = shalt.err (%p281_p2)  }

</bundles_post_ra>
